<compile_context>
chip_gen: v7x
topology: tpu7x:2x2x1
jax: 0.10.0
libtpu: 0.0.40
codegen_flags: <defaults>
</compile_context>

<pallas_src>
import math
import functools

import jax
import jax.numpy as jnp
from jax.experimental import pallas as pl
from jax.experimental.pallas import tpu as pltpu

NEG_INF = -1000000000.0  # matches torch masked_fill value in the reference code


def _mha_kernel(q_ref, k_ref, v_ref, pad_ref,
                wq_ref, bq_ref, wk_ref, bk_ref, wv_ref, bv_ref, wo_ref, bo_ref,
                o_ref, *, num_heads, d_k, q_tile):
    # q_ref:   (1, tq, D)   query rows for this (batch, q-tile) grid step
    # k/v_ref: (1, S,  D)   full key/value rows for this batch element
    # pad_ref: (1, 1,  S)   key padding mask (1.0 = keep, 0.0 = pad)
    # w{q,k,v}_ref: (H, D, d_k); b{q,k,v}_ref: (H, 1, d_k)
    # wo_ref:  (H, d_k, D); bo_ref: (1, D)
    q_in = q_ref[0]                       # (tq, D)
    k_in = k_ref[0]                       # (S,  D)
    v_in = v_ref[0]                       # (S,  D)

    tq, d_model = q_in.shape
    s_len = k_in.shape[0]

    # Rebuild the combined (causal AND key-padding) mask in-kernel: (tq, S) bool.
    # TODO(synk): arbitrary (non-causal) `mask` tensors from the PyTorch API would
    # need an explicit dense mask input; the causal*padding case is built here.
    q0 = pl.program_id(1) * q_tile
    row = q0 + jax.lax.broadcasted_iota(jnp.int32, (tq, s_len), 0)
    col = jax.lax.broadcasted_iota(jnp.int32, (tq, s_len), 1)
    keep = (col <= row) & (pad_ref[0] > 0.5)          # (tq, S); pad broadcasts

    inv_sqrt_dk = jnp.float32(1.0 / math.sqrt(d_k))
    neg_inf = jnp.float32(NEG_INF)
    contract_last = (((1,), (1,)), ((), ()))          # contract last dims; no K.T

    # Lane-dense output accumulator (tq, D); start from the output bias.
    acc = jnp.zeros((tq, d_model), jnp.float32) + bo_ref[...]

    # Static (unrolled) loop over heads; each step is plain 2-D MXU matmuls on
    # per-head weight panels indexed along the leading (non-lane) axis.
    for h in range(num_heads):
        qh = jnp.dot(q_in, wq_ref[h], preferred_element_type=jnp.float32) + bq_ref[h]
        kh = jnp.dot(k_in, wk_ref[h], preferred_element_type=jnp.float32) + bk_ref[h]
        vh = jnp.dot(v_in, wv_ref[h], preferred_element_type=jnp.float32) + bv_ref[h]

        scores = jax.lax.dot_general(
            qh, kh, contract_last, preferred_element_type=jnp.float32) * inv_sqrt_dk
        scores = jnp.where(keep, scores, neg_inf)     # masked_fill(~mask, -1e9)

        m = jnp.max(scores, axis=-1, keepdims=True)
        e = jnp.exp(scores - m)
        p = e * pl.reciprocal(jnp.sum(e, axis=-1, keepdims=True), approx=True)
        # One select covers both the reference isnan guard (NEG_INF is finite, so
        # NaN never occurs) and masked_fill(~mask, 0.0) after softmax.
        p = jnp.where(keep, p, 0.0)
        # TODO(synk): dropout is identity (eval mode); relation_matrix=None path.

        ctx = jnp.dot(p, vh, preferred_element_type=jnp.float32)          # (tq, d_k)
        # Head merge folded into the output projection: sum_h ctx_h @ Wo_h is
        # mathematically identical to concat_h(ctx_h) @ Wo, with no lane concat.
        acc = acc + jnp.dot(ctx, wo_ref[h], preferred_element_type=jnp.float32)

    o_ref[0] = acc.astype(o_ref.dtype)


def multihead_attention(q, k, v, key_padding_mask, params, *, num_heads, q_tile=None):
    """q, k, v: (B, S, D). key_padding_mask: (B, S) with 1=keep, 0=pad.
    params: nn.Linear weights transposed to (D_in, D_out) and biases as (1, D)."""
    B, Sq, D = q.shape
    S = k.shape[1]
    d_k = D // num_heads
    wq, bq, wk, bk, wv, bv, wo, bo = params

    if q_tile is None:
        q_tile = Sq if Sq <= 128 else 128
    assert Sq % q_tile == 0, "seq_len must be divisible by the query tile"
    n_q = Sq // q_tile

    # Host-side layout plumbing: per-head weight panels (no lane slicing in-kernel).
    def split_in(w, b):
        return (w.reshape(D, num_heads, d_k).transpose(1, 0, 2),   # (H, D, d_k)
                b.reshape(num_heads, 1, d_k))                      # (H, 1, d_k)

    wq_h, bq_h = split_in(wq, bq)
    wk_h, bk_h = split_in(wk, bk)
    wv_h, bv_h = split_in(wv, bv)
    wo_h = wo.reshape(num_heads, d_k, D)                           # (H, d_k, D)

    pad = key_padding_mask.astype(jnp.float32).reshape(B, 1, S)    # O(S) bytes/batch

    kernel = functools.partial(_mha_kernel, num_heads=num_heads, d_k=d_k,
                               q_tile=q_tile)

    q_spec = pl.BlockSpec((1, q_tile, D), lambda b, i: (b, i, 0))
    kv_spec = pl.BlockSpec((1, S, D), lambda b, i: (b, 0, 0))
    pad_spec = pl.BlockSpec((1, 1, S), lambda b, i: (b, 0, 0))
    win_spec = pl.BlockSpec((num_heads, D, d_k), lambda b, i: (0, 0, 0))
    bin_spec = pl.BlockSpec((num_heads, 1, d_k), lambda b, i: (0, 0, 0))
    wo_spec = pl.BlockSpec((num_heads, d_k, D), lambda b, i: (0, 0, 0))
    bo_spec = pl.BlockSpec((1, D), lambda b, i: (0, 0))

    return pl.pallas_call(
        kernel,
        out_shape=jax.ShapeDtypeStruct((B, Sq, D), q.dtype),
        grid_spec=pltpu.PrefetchScalarGridSpec(
            num_scalar_prefetch=0,
            grid=(B, n_q),
            in_specs=[q_spec, kv_spec, kv_spec, pad_spec,
                      win_spec, bin_spec, win_spec, bin_spec,
                      win_spec, bin_spec, wo_spec, bo_spec],
            out_specs=q_spec,
        ),
        compiler_params=pltpu.CompilerParams(
            dimension_semantics=("parallel", "parallel")),
    )(q, k, v, pad, wq_h, bq_h, wk_h, bk_h, wv_h, bv_h, wo_h, bo)


def _reference(q, k, v, comb_mask_bool, params, *, num_heads):
    """Plain-JAX reference mirroring the PyTorch forward (eval mode)."""
    B, S, D = q.shape
    d_k = D // num_heads
    wq, bq, wk, bk, wv, bv, wo, bo = params

    def proj(x, w, b):
        y = jnp.einsum("bsd,de->bse", x, w, precision=jax.lax.Precision.HIGHEST) + b[0]
        return y.reshape(B, S, num_heads, d_k).transpose(0, 2, 1, 3)  # (B, h, S, d_k)

    Q, K, V = proj(q, wq, bq), proj(k, wk, bk), proj(v, wv, bv)
    scores = jnp.einsum("bhqd,bhkd->bhqk", Q, K,
                        precision=jax.lax.Precision.HIGHEST) / math.sqrt(d_k)
    mask4 = comb_mask_bool[:, None, :, :]                       # (B, 1, S, S)
    scores = jnp.where(mask4, scores, NEG_INF)
    p = jax.nn.softmax(scores, axis=-1)
    p = jnp.where(jnp.isnan(p), 0.0, p)
    p = jnp.where(mask4, p, 0.0)
    x = jnp.einsum("bhqk,bhkd->bhqd", p, V, precision=jax.lax.Precision.HIGHEST)
    x = x.transpose(0, 2, 1, 3).reshape(B, S, D)
    return jnp.einsum("bsd,de->bse", x, wo, precision=jax.lax.Precision.HIGHEST) + bo[0]


if __name__ == "__main__":
    B, S, D, H = 2, 8, 32, 4  # batch, seq, dim_model, heads

    key = jax.random.PRNGKey(0)
    keys = jax.random.split(key, 16)

    # Deterministic nn.Linear-style init: U(-1/sqrt(fan_in), 1/sqrt(fan_in)).
    bound = 1.0 / math.sqrt(D)

    def make_linear(kw, kb):
        w = jax.random.uniform(kw, (D, D), jnp.float32, -bound, bound)  # (in, out)
        b = jax.random.uniform(kb, (1, D), jnp.float32, -bound, bound)
        return w, b

    wq, bq = make_linear(keys[0], keys[1])
    wk, bk = make_linear(keys[2], keys[3])
    wv, bv = make_linear(keys[4], keys[5])
    wo, bo = make_linear(keys[6], keys[7])
    params = (wq, bq, wk, bk, wv, bv, wo, bo)

    q = jax.random.normal(keys[8], (B, S, D), jnp.float32)
    k = jax.random.normal(keys[9], (B, S, D), jnp.float32)
    v = jax.random.normal(keys[10], (B, S, D), jnp.float32)

    # mask: causal (S, S); padding_mask: (B, S) with last 2 positions of batch 1 padded.
    causal = jnp.tril(jnp.ones((S, S), dtype=bool))
    padding = jnp.ones((B, S), dtype=bool).at[1, -2:].set(False)
    # Combined mask (mask * padding_mask broadcast), identical across heads.
    comb_mask_bool = causal[None, :, :] & padding[:, None, :]          # (B, S, S)

    out = multihead_attention(q, k, v, padding, params, num_heads=H)
    out = jax.block_until_ready(out)

    ref = _reference(q, k, v, comb_mask_bool, params, num_heads=H)
    assert out.shape == (B, S, D)
    assert bool(jnp.allclose(out, ref, rtol=1e-2, atol=1e-2)), "mismatch vs reference"

    print("KERNEL_OK")
</pallas_src>

<mosaic_0001>
module attributes {stable_mosaic.version = 11 : i64} {
  func.func @_mha_kernel(%arg0: i32, %arg1: i32, %arg2: memref<1x8x32xf32, #tpu.memory_space<vmem>>, %arg3: memref<1x8x32xf32, #tpu.memory_space<vmem>>, %arg4: memref<1x8x32xf32, #tpu.memory_space<vmem>>, %arg5: memref<1x1x8xf32, #tpu.memory_space<vmem>>, %arg6: memref<4x32x8xf32, #tpu.memory_space<vmem>>, %arg7: memref<4x1x8xf32, #tpu.memory_space<vmem>>, %arg8: memref<4x32x8xf32, #tpu.memory_space<vmem>>, %arg9: memref<4x1x8xf32, #tpu.memory_space<vmem>>, %arg10: memref<4x32x8xf32, #tpu.memory_space<vmem>>, %arg11: memref<4x1x8xf32, #tpu.memory_space<vmem>>, %arg12: memref<4x8x32xf32, #tpu.memory_space<vmem>>, %arg13: memref<1x32xf32, #tpu.memory_space<vmem>>, %arg14: memref<1x8x32xf32, #tpu.memory_space<vmem>>) attributes {dimension_semantics = [#tpu.dimension_semantics<parallel>, #tpu.dimension_semantics<parallel>], iteration_bounds = array<i64: 2, 1>, scalar_prefetch = 0 : i64, scratch_operands = 0 : i64, tpu.core_type = #tpu.core_type<tc>, window_params = [{transform_indices = @transform_0, window_bounds = array<i64: 1, 8, 32>}, {transform_indices = @transform_1, window_bounds = array<i64: 1, 8, 32>}, {transform_indices = @transform_2, window_bounds = array<i64: 1, 8, 32>}, {transform_indices = @transform_3, window_bounds = array<i64: 1, 1, 8>}, {pipeline_mode = #tpu.pipeline_mode<synchronous>, transform_indices = @transform_4, window_bounds = array<i64: 4, 32, 8>}, {pipeline_mode = #tpu.pipeline_mode<synchronous>, transform_indices = @transform_5, window_bounds = array<i64: 4, 1, 8>}, {pipeline_mode = #tpu.pipeline_mode<synchronous>, transform_indices = @transform_6, window_bounds = array<i64: 4, 32, 8>}, {pipeline_mode = #tpu.pipeline_mode<synchronous>, transform_indices = @transform_7, window_bounds = array<i64: 4, 1, 8>}, {pipeline_mode = #tpu.pipeline_mode<synchronous>, transform_indices = @transform_8, window_bounds = array<i64: 4, 32, 8>}, {pipeline_mode = #tpu.pipeline_mode<synchronous>, transform_indices = @transform_9, window_bounds = array<i64: 4, 1, 8>}, {pipeline_mode = #tpu.pipeline_mode<synchronous>, transform_indices = @transform_10, window_bounds = array<i64: 4, 8, 32>}, {pipeline_mode = #tpu.pipeline_mode<synchronous>, transform_indices = @transform_11, window_bounds = array<i64: 1, 32>}, {transform_indices = @transform_12, window_bounds = array<i64: 1, 8, 32>}]} {
    %c0 = arith.constant 0 : index
    %c0_0 = arith.constant 0 : index
    %c0_1 = arith.constant 0 : index
    %0 = vector.load %arg2[%c0, %c0_0, %c0_1] : memref<1x8x32xf32, #tpu.memory_space<vmem>>, vector<1x8x32xf32>
    %1 = vector.shape_cast %0 : vector<1x8x32xf32> to vector<8x32xf32>
    %c0_2 = arith.constant 0 : index
    %c0_3 = arith.constant 0 : index
    %c0_4 = arith.constant 0 : index
    %2 = vector.load %arg3[%c0_2, %c0_3, %c0_4] : memref<1x8x32xf32, #tpu.memory_space<vmem>>, vector<1x8x32xf32>
    %3 = vector.shape_cast %2 : vector<1x8x32xf32> to vector<8x32xf32>
    %c0_5 = arith.constant 0 : index
    %c0_6 = arith.constant 0 : index
    %c0_7 = arith.constant 0 : index
    %4 = vector.load %arg4[%c0_5, %c0_6, %c0_7] : memref<1x8x32xf32, #tpu.memory_space<vmem>>, vector<1x8x32xf32>
    %5 = vector.shape_cast %4 : vector<1x8x32xf32> to vector<8x32xf32>
    %c8_i32 = arith.constant 8 : i32
    %6 = arith.muli %arg1, %c8_i32 : i32
    %7 = tpu.iota {dimensions = array<i32: 0>} : vector<8x8xi32>
    %8 = vector.broadcast %6 : i32 to vector<8x8xi32>
    %9 = arith.addi %8, %7 : vector<8x8xi32>
    %10 = tpu.iota {dimensions = array<i32: 1>} : vector<8x8xi32>
    %11 = arith.cmpi sle, %10, %9 : vector<8x8xi32>
    %c0_8 = arith.constant 0 : index
    %c0_9 = arith.constant 0 : index
    %c0_10 = arith.constant 0 : index
    %12 = vector.load %arg5[%c0_8, %c0_9, %c0_10] : memref<1x1x8xf32, #tpu.memory_space<vmem>>, vector<1x1x8xf32>
    %13 = vector.shape_cast %12 : vector<1x1x8xf32> to vector<1x8xf32>
    %cst = arith.constant 5.000000e-01 : f32
    %14 = vector.broadcast %cst : f32 to vector<1x8xf32>
    %15 = arith.cmpf ogt, %13, %14 : vector<1x8xf32>
    %16 = vector.broadcast %15 : vector<1x8xi1> to vector<8x8xi1>
    %17 = arith.andi %11, %16 : vector<8x8xi1>
    %cst_11 = arith.constant 0.000000e+00 : f32
    %18 = vector.broadcast %cst_11 : f32 to vector<8x32xf32>
    %c0_12 = arith.constant 0 : index
    %c0_13 = arith.constant 0 : index
    %19 = vector.load %arg13[%c0_12, %c0_13] : memref<1x32xf32, #tpu.memory_space<vmem>>, vector<1x32xf32>
    %20 = vector.broadcast %19 : vector<1x32xf32> to vector<8x32xf32>
    %21 = arith.addf %18, %20 : vector<8x32xf32>
    %c0_14 = arith.constant 0 : index
    %c0_15 = arith.constant 0 : index
    %c0_16 = arith.constant 0 : index
    %22 = vector.load %arg6[%c0_14, %c0_15, %c0_16] : memref<4x32x8xf32, #tpu.memory_space<vmem>>, vector<1x32x8xf32>
    %23 = vector.shape_cast %22 : vector<1x32x8xf32> to vector<32x8xf32>
    %cst_17 = arith.constant dense<0.000000e+00> : vector<8x8xf32>
    %24 = tpu.matmul %1, %23, %cst_17 {dimension_numbers = #tpu.dot_dimension_numbers<[1], [0], [0], [1], [0, 0, 1, 1], [], []>} : vector<8x32xf32>, vector<32x8xf32>, vector<8x8xf32> -> vector<8x8xf32>
    %c0_18 = arith.constant 0 : index
    %c0_19 = arith.constant 0 : index
    %c0_20 = arith.constant 0 : index
    %25 = vector.load %arg7[%c0_18, %c0_19, %c0_20] : memref<4x1x8xf32, #tpu.memory_space<vmem>>, vector<1x1x8xf32>
    %26 = vector.shape_cast %25 : vector<1x1x8xf32> to vector<1x8xf32>
    %27 = vector.broadcast %26 : vector<1x8xf32> to vector<8x8xf32>
    %28 = arith.addf %24, %27 : vector<8x8xf32>
    %c0_21 = arith.constant 0 : index
    %c0_22 = arith.constant 0 : index
    %c0_23 = arith.constant 0 : index
    %29 = vector.load %arg8[%c0_21, %c0_22, %c0_23] : memref<4x32x8xf32, #tpu.memory_space<vmem>>, vector<1x32x8xf32>
    %30 = vector.shape_cast %29 : vector<1x32x8xf32> to vector<32x8xf32>
    %cst_24 = arith.constant dense<0.000000e+00> : vector<8x8xf32>
    %31 = tpu.matmul %3, %30, %cst_24 {dimension_numbers = #tpu.dot_dimension_numbers<[1], [0], [0], [1], [0, 0, 1, 1], [], []>} : vector<8x32xf32>, vector<32x8xf32>, vector<8x8xf32> -> vector<8x8xf32>
    %c0_25 = arith.constant 0 : index
    %c0_26 = arith.constant 0 : index
    %c0_27 = arith.constant 0 : index
    %32 = vector.load %arg9[%c0_25, %c0_26, %c0_27] : memref<4x1x8xf32, #tpu.memory_space<vmem>>, vector<1x1x8xf32>
    %33 = vector.shape_cast %32 : vector<1x1x8xf32> to vector<1x8xf32>
    %34 = vector.broadcast %33 : vector<1x8xf32> to vector<8x8xf32>
    %35 = arith.addf %31, %34 : vector<8x8xf32>
    %c0_28 = arith.constant 0 : index
    %c0_29 = arith.constant 0 : index
    %c0_30 = arith.constant 0 : index
    %36 = vector.load %arg10[%c0_28, %c0_29, %c0_30] : memref<4x32x8xf32, #tpu.memory_space<vmem>>, vector<1x32x8xf32>
    %37 = vector.shape_cast %36 : vector<1x32x8xf32> to vector<32x8xf32>
    %cst_31 = arith.constant dense<0.000000e+00> : vector<8x8xf32>
    %38 = tpu.matmul %5, %37, %cst_31 {dimension_numbers = #tpu.dot_dimension_numbers<[1], [0], [0], [1], [0, 0, 1, 1], [], []>} : vector<8x32xf32>, vector<32x8xf32>, vector<8x8xf32> -> vector<8x8xf32>
    %c0_32 = arith.constant 0 : index
    %c0_33 = arith.constant 0 : index
    %c0_34 = arith.constant 0 : index
    %39 = vector.load %arg11[%c0_32, %c0_33, %c0_34] : memref<4x1x8xf32, #tpu.memory_space<vmem>>, vector<1x1x8xf32>
    %40 = vector.shape_cast %39 : vector<1x1x8xf32> to vector<1x8xf32>
    %41 = vector.broadcast %40 : vector<1x8xf32> to vector<8x8xf32>
    %42 = arith.addf %38, %41 : vector<8x8xf32>
    %cst_35 = arith.constant dense<0.000000e+00> : vector<8x8xf32>
    %43 = tpu.matmul %28, %35, %cst_35 {dimension_numbers = #tpu.dot_dimension_numbers<[1], [1], [0], [0], [0, 0, 1, 0], [], []>} : vector<8x8xf32>, vector<8x8xf32>, vector<8x8xf32> -> vector<8x8xf32>
    %cst_36 = arith.constant 0.353553385 : f32
    %44 = vector.broadcast %cst_36 : f32 to vector<8x8xf32>
    %45 = arith.mulf %43, %44 : vector<8x8xf32>
    %cst_37 = arith.constant -1.000000e+09 : f32
    %46 = vector.broadcast %cst_37 : f32 to vector<8x8xf32>
    %47 = arith.select %17, %45, %46 : vector<8x8xi1>, vector<8x8xf32>
    %cst_38 = arith.constant dense<0xFF800000> : vector<8xf32>
    %48 = vector.multi_reduction <maximumf>, %47, %cst_38 [1] : vector<8x8xf32> to vector<8xf32>
    %49 = vector.shape_cast %48 : vector<8xf32> to vector<8x1xf32>
    %50 = vector.broadcast %49 : vector<8x1xf32> to vector<8x8xf32>
    %51 = arith.subf %47, %50 : vector<8x8xf32>
    %52 = math.exp %51 : vector<8x8xf32>
    %cst_39 = arith.constant dense<0.000000e+00> : vector<8xf32>
    %53 = vector.multi_reduction <add>, %52, %cst_39 [1] : vector<8x8xf32> to vector<8xf32>
    %54 = vector.shape_cast %53 : vector<8xf32> to vector<8x1xf32>
    %55 = tpu.reciprocal %54 {approx = true} : vector<8x1xf32> -> vector<8x1xf32>
    %56 = vector.broadcast %55 : vector<8x1xf32> to vector<8x8xf32>
    %57 = arith.mulf %52, %56 : vector<8x8xf32>
    %cst_40 = arith.constant 0.000000e+00 : f32
    %58 = vector.broadcast %cst_40 : f32 to vector<8x8xf32>
    %59 = arith.select %17, %57, %58 : vector<8x8xi1>, vector<8x8xf32>
    %cst_41 = arith.constant dense<0.000000e+00> : vector<8x8xf32>
    %60 = tpu.matmul %59, %42, %cst_41 {dimension_numbers = #tpu.dot_dimension_numbers<[1], [0], [0], [1], [0, 0, 1, 1], [], []>} : vector<8x8xf32>, vector<8x8xf32>, vector<8x8xf32> -> vector<8x8xf32>
    %c0_42 = arith.constant 0 : index
    %c0_43 = arith.constant 0 : index
    %c0_44 = arith.constant 0 : index
    %61 = vector.load %arg12[%c0_42, %c0_43, %c0_44] : memref<4x8x32xf32, #tpu.memory_space<vmem>>, vector<1x8x32xf32>
    %62 = vector.shape_cast %61 : vector<1x8x32xf32> to vector<8x32xf32>
    %cst_45 = arith.constant dense<0.000000e+00> : vector<8x32xf32>
    %63 = tpu.matmul %60, %62, %cst_45 {dimension_numbers = #tpu.dot_dimension_numbers<[1], [0], [0], [1], [0, 0, 1, 1], [], []>} : vector<8x8xf32>, vector<8x32xf32>, vector<8x32xf32> -> vector<8x32xf32>
    %64 = arith.addf %21, %63 : vector<8x32xf32>
    %c1 = arith.constant 1 : index
    %c0_46 = arith.constant 0 : index
    %c0_47 = arith.constant 0 : index
    %65 = vector.load %arg6[%c1, %c0_46, %c0_47] : memref<4x32x8xf32, #tpu.memory_space<vmem>>, vector<1x32x8xf32>
    %66 = vector.shape_cast %65 : vector<1x32x8xf32> to vector<32x8xf32>
    %cst_48 = arith.constant dense<0.000000e+00> : vector<8x8xf32>
    %67 = tpu.matmul %1, %66, %cst_48 {dimension_numbers = #tpu.dot_dimension_numbers<[1], [0], [0], [1], [0, 0, 1, 1], [], []>} : vector<8x32xf32>, vector<32x8xf32>, vector<8x8xf32> -> vector<8x8xf32>
    %c1_49 = arith.constant 1 : index
    %c0_50 = arith.constant 0 : index
    %c0_51 = arith.constant 0 : index
    %68 = vector.load %arg7[%c1_49, %c0_50, %c0_51] : memref<4x1x8xf32, #tpu.memory_space<vmem>>, vector<1x1x8xf32>
    %69 = vector.shape_cast %68 : vector<1x1x8xf32> to vector<1x8xf32>
    %70 = vector.broadcast %69 : vector<1x8xf32> to vector<8x8xf32>
    %71 = arith.addf %67, %70 : vector<8x8xf32>
    %c1_52 = arith.constant 1 : index
    %c0_53 = arith.constant 0 : index
    %c0_54 = arith.constant 0 : index
    %72 = vector.load %arg8[%c1_52, %c0_53, %c0_54] : memref<4x32x8xf32, #tpu.memory_space<vmem>>, vector<1x32x8xf32>
    %73 = vector.shape_cast %72 : vector<1x32x8xf32> to vector<32x8xf32>
    %cst_55 = arith.constant dense<0.000000e+00> : vector<8x8xf32>
    %74 = tpu.matmul %3, %73, %cst_55 {dimension_numbers = #tpu.dot_dimension_numbers<[1], [0], [0], [1], [0, 0, 1, 1], [], []>} : vector<8x32xf32>, vector<32x8xf32>, vector<8x8xf32> -> vector<8x8xf32>
    %c1_56 = arith.constant 1 : index
    %c0_57 = arith.constant 0 : index
    %c0_58 = arith.constant 0 : index
    %75 = vector.load %arg9[%c1_56, %c0_57, %c0_58] : memref<4x1x8xf32, #tpu.memory_space<vmem>>, vector<1x1x8xf32>
    %76 = vector.shape_cast %75 : vector<1x1x8xf32> to vector<1x8xf32>
    %77 = vector.broadcast %76 : vector<1x8xf32> to vector<8x8xf32>
    %78 = arith.addf %74, %77 : vector<8x8xf32>
    %c1_59 = arith.constant 1 : index
    %c0_60 = arith.constant 0 : index
    %c0_61 = arith.constant 0 : index
    %79 = vector.load %arg10[%c1_59, %c0_60, %c0_61] : memref<4x32x8xf32, #tpu.memory_space<vmem>>, vector<1x32x8xf32>
    %80 = vector.shape_cast %79 : vector<1x32x8xf32> to vector<32x8xf32>
    %cst_62 = arith.constant dense<0.000000e+00> : vector<8x8xf32>
    %81 = tpu.matmul %5, %80, %cst_62 {dimension_numbers = #tpu.dot_dimension_numbers<[1], [0], [0], [1], [0, 0, 1, 1], [], []>} : vector<8x32xf32>, vector<32x8xf32>, vector<8x8xf32> -> vector<8x8xf32>
    %c1_63 = arith.constant 1 : index
    %c0_64 = arith.constant 0 : index
    %c0_65 = arith.constant 0 : index
    %82 = vector.load %arg11[%c1_63, %c0_64, %c0_65] : memref<4x1x8xf32, #tpu.memory_space<vmem>>, vector<1x1x8xf32>
    %83 = vector.shape_cast %82 : vector<1x1x8xf32> to vector<1x8xf32>
    %84 = vector.broadcast %83 : vector<1x8xf32> to vector<8x8xf32>
    %85 = arith.addf %81, %84 : vector<8x8xf32>
    %cst_66 = arith.constant dense<0.000000e+00> : vector<8x8xf32>
    %86 = tpu.matmul %71, %78, %cst_66 {dimension_numbers = #tpu.dot_dimension_numbers<[1], [1], [0], [0], [0, 0, 1, 0], [], []>} : vector<8x8xf32>, vector<8x8xf32>, vector<8x8xf32> -> vector<8x8xf32>
    %cst_67 = arith.constant 0.353553385 : f32
    %87 = vector.broadcast %cst_67 : f32 to vector<8x8xf32>
    %88 = arith.mulf %86, %87 : vector<8x8xf32>
    %cst_68 = arith.constant -1.000000e+09 : f32
    %89 = vector.broadcast %cst_68 : f32 to vector<8x8xf32>
    %90 = arith.select %17, %88, %89 : vector<8x8xi1>, vector<8x8xf32>
    %cst_69 = arith.constant dense<0xFF800000> : vector<8xf32>
    %91 = vector.multi_reduction <maximumf>, %90, %cst_69 [1] : vector<8x8xf32> to vector<8xf32>
    %92 = vector.shape_cast %91 : vector<8xf32> to vector<8x1xf32>
    %93 = vector.broadcast %92 : vector<8x1xf32> to vector<8x8xf32>
    %94 = arith.subf %90, %93 : vector<8x8xf32>
    %95 = math.exp %94 : vector<8x8xf32>
    %cst_70 = arith.constant dense<0.000000e+00> : vector<8xf32>
    %96 = vector.multi_reduction <add>, %95, %cst_70 [1] : vector<8x8xf32> to vector<8xf32>
    %97 = vector.shape_cast %96 : vector<8xf32> to vector<8x1xf32>
    %98 = tpu.reciprocal %97 {approx = true} : vector<8x1xf32> -> vector<8x1xf32>
    %99 = vector.broadcast %98 : vector<8x1xf32> to vector<8x8xf32>
    %100 = arith.mulf %95, %99 : vector<8x8xf32>
    %cst_71 = arith.constant 0.000000e+00 : f32
    %101 = vector.broadcast %cst_71 : f32 to vector<8x8xf32>
    %102 = arith.select %17, %100, %101 : vector<8x8xi1>, vector<8x8xf32>
    %cst_72 = arith.constant dense<0.000000e+00> : vector<8x8xf32>
    %103 = tpu.matmul %102, %85, %cst_72 {dimension_numbers = #tpu.dot_dimension_numbers<[1], [0], [0], [1], [0, 0, 1, 1], [], []>} : vector<8x8xf32>, vector<8x8xf32>, vector<8x8xf32> -> vector<8x8xf32>
    %c1_73 = arith.constant 1 : index
    %c0_74 = arith.constant 0 : index
    %c0_75 = arith.constant 0 : index
    %104 = vector.load %arg12[%c1_73, %c0_74, %c0_75] : memref<4x8x32xf32, #tpu.memory_space<vmem>>, vector<1x8x32xf32>
    %105 = vector.shape_cast %104 : vector<1x8x32xf32> to vector<8x32xf32>
    %cst_76 = arith.constant dense<0.000000e+00> : vector<8x32xf32>
    %106 = tpu.matmul %103, %105, %cst_76 {dimension_numbers = #tpu.dot_dimension_numbers<[1], [0], [0], [1], [0, 0, 1, 1], [], []>} : vector<8x8xf32>, vector<8x32xf32>, vector<8x32xf32> -> vector<8x32xf32>
    %107 = arith.addf %64, %106 : vector<8x32xf32>
    %c2 = arith.constant 2 : index
    %c0_77 = arith.constant 0 : index
    %c0_78 = arith.constant 0 : index
    %108 = vector.load %arg6[%c2, %c0_77, %c0_78] : memref<4x32x8xf32, #tpu.memory_space<vmem>>, vector<1x32x8xf32>
    %109 = vector.shape_cast %108 : vector<1x32x8xf32> to vector<32x8xf32>
    %cst_79 = arith.constant dense<0.000000e+00> : vector<8x8xf32>
    %110 = tpu.matmul %1, %109, %cst_79 {dimension_numbers = #tpu.dot_dimension_numbers<[1], [0], [0], [1], [0, 0, 1, 1], [], []>} : vector<8x32xf32>, vector<32x8xf32>, vector<8x8xf32> -> vector<8x8xf32>
    %c2_80 = arith.constant 2 : index
    %c0_81 = arith.constant 0 : index
    %c0_82 = arith.constant 0 : index
    %111 = vector.load %arg7[%c2_80, %c0_81, %c0_82] : memref<4x1x8xf32, #tpu.memory_space<vmem>>, vector<1x1x8xf32>
    %112 = vector.shape_cast %111 : vector<1x1x8xf32> to vector<1x8xf32>
    %113 = vector.broadcast %112 : vector<1x8xf32> to vector<8x8xf32>
    %114 = arith.addf %110, %113 : vector<8x8xf32>
    %c2_83 = arith.constant 2 : index
    %c0_84 = arith.constant 0 : index
    %c0_85 = arith.constant 0 : index
    %115 = vector.load %arg8[%c2_83, %c0_84, %c0_85] : memref<4x32x8xf32, #tpu.memory_space<vmem>>, vector<1x32x8xf32>
    %116 = vector.shape_cast %115 : vector<1x32x8xf32> to vector<32x8xf32>
    %cst_86 = arith.constant dense<0.000000e+00> : vector<8x8xf32>
    %117 = tpu.matmul %3, %116, %cst_86 {dimension_numbers = #tpu.dot_dimension_numbers<[1], [0], [0], [1], [0, 0, 1, 1], [], []>} : vector<8x32xf32>, vector<32x8xf32>, vector<8x8xf32> -> vector<8x8xf32>
    %c2_87 = arith.constant 2 : index
    %c0_88 = arith.constant 0 : index
    %c0_89 = arith.constant 0 : index
    %118 = vector.load %arg9[%c2_87, %c0_88, %c0_89] : memref<4x1x8xf32, #tpu.memory_space<vmem>>, vector<1x1x8xf32>
    %119 = vector.shape_cast %118 : vector<1x1x8xf32> to vector<1x8xf32>
    %120 = vector.broadcast %119 : vector<1x8xf32> to vector<8x8xf32>
    %121 = arith.addf %117, %120 : vector<8x8xf32>
    %c2_90 = arith.constant 2 : index
    %c0_91 = arith.constant 0 : index
    %c0_92 = arith.constant 0 : index
    %122 = vector.load %arg10[%c2_90, %c0_91, %c0_92] : memref<4x32x8xf32, #tpu.memory_space<vmem>>, vector<1x32x8xf32>
    %123 = vector.shape_cast %122 : vector<1x32x8xf32> to vector<32x8xf32>
    %cst_93 = arith.constant dense<0.000000e+00> : vector<8x8xf32>
    %124 = tpu.matmul %5, %123, %cst_93 {dimension_numbers = #tpu.dot_dimension_numbers<[1], [0], [0], [1], [0, 0, 1, 1], [], []>} : vector<8x32xf32>, vector<32x8xf32>, vector<8x8xf32> -> vector<8x8xf32>
    %c2_94 = arith.constant 2 : index
    %c0_95 = arith.constant 0 : index
    %c0_96 = arith.constant 0 : index
    %125 = vector.load %arg11[%c2_94, %c0_95, %c0_96] : memref<4x1x8xf32, #tpu.memory_space<vmem>>, vector<1x1x8xf32>
    %126 = vector.shape_cast %125 : vector<1x1x8xf32> to vector<1x8xf32>
    %127 = vector.broadcast %126 : vector<1x8xf32> to vector<8x8xf32>
    %128 = arith.addf %124, %127 : vector<8x8xf32>
    %cst_97 = arith.constant dense<0.000000e+00> : vector<8x8xf32>
    %129 = tpu.matmul %114, %121, %cst_97 {dimension_numbers = #tpu.dot_dimension_numbers<[1], [1], [0], [0], [0, 0, 1, 0], [], []>} : vector<8x8xf32>, vector<8x8xf32>, vector<8x8xf32> -> vector<8x8xf32>
    %cst_98 = arith.constant 0.353553385 : f32
    %130 = vector.broadcast %cst_98 : f32 to vector<8x8xf32>
    %131 = arith.mulf %129, %130 : vector<8x8xf32>
    %cst_99 = arith.constant -1.000000e+09 : f32
    %132 = vector.broadcast %cst_99 : f32 to vector<8x8xf32>
    %133 = arith.select %17, %131, %132 : vector<8x8xi1>, vector<8x8xf32>
    %cst_100 = arith.constant dense<0xFF800000> : vector<8xf32>
    %134 = vector.multi_reduction <maximumf>, %133, %cst_100 [1] : vector<8x8xf32> to vector<8xf32>
    %135 = vector.shape_cast %134 : vector<8xf32> to vector<8x1xf32>
    %136 = vector.broadcast %135 : vector<8x1xf32> to vector<8x8xf32>
    %137 = arith.subf %133, %136 : vector<8x8xf32>
    %138 = math.exp %137 : vector<8x8xf32>
    %cst_101 = arith.constant dense<0.000000e+00> : vector<8xf32>
    %139 = vector.multi_reduction <add>, %138, %cst_101 [1] : vector<8x8xf32> to vector<8xf32>
    %140 = vector.shape_cast %139 : vector<8xf32> to vector<8x1xf32>
    %141 = tpu.reciprocal %140 {approx = true} : vector<8x1xf32> -> vector<8x1xf32>
    %142 = vector.broadcast %141 : vector<8x1xf32> to vector<8x8xf32>
    %143 = arith.mulf %138, %142 : vector<8x8xf32>
    %cst_102 = arith.constant 0.000000e+00 : f32
    %144 = vector.broadcast %cst_102 : f32 to vector<8x8xf32>
    %145 = arith.select %17, %143, %144 : vector<8x8xi1>, vector<8x8xf32>
    %cst_103 = arith.constant dense<0.000000e+00> : vector<8x8xf32>
    %146 = tpu.matmul %145, %128, %cst_103 {dimension_numbers = #tpu.dot_dimension_numbers<[1], [0], [0], [1], [0, 0, 1, 1], [], []>} : vector<8x8xf32>, vector<8x8xf32>, vector<8x8xf32> -> vector<8x8xf32>
    %c2_104 = arith.constant 2 : index
    %c0_105 = arith.constant 0 : index
    %c0_106 = arith.constant 0 : index
    %147 = vector.load %arg12[%c2_104, %c0_105, %c0_106] : memref<4x8x32xf32, #tpu.memory_space<vmem>>, vector<1x8x32xf32>
    %148 = vector.shape_cast %147 : vector<1x8x32xf32> to vector<8x32xf32>
    %cst_107 = arith.constant dense<0.000000e+00> : vector<8x32xf32>
    %149 = tpu.matmul %146, %148, %cst_107 {dimension_numbers = #tpu.dot_dimension_numbers<[1], [0], [0], [1], [0, 0, 1, 1], [], []>} : vector<8x8xf32>, vector<8x32xf32>, vector<8x32xf32> -> vector<8x32xf32>
    %150 = arith.addf %107, %149 : vector<8x32xf32>
    %c3 = arith.constant 3 : index
    %c0_108 = arith.constant 0 : index
    %c0_109 = arith.constant 0 : index
    %151 = vector.load %arg6[%c3, %c0_108, %c0_109] : memref<4x32x8xf32, #tpu.memory_space<vmem>>, vector<1x32x8xf32>
    %152 = vector.shape_cast %151 : vector<1x32x8xf32> to vector<32x8xf32>
    %cst_110 = arith.constant dense<0.000000e+00> : vector<8x8xf32>
    %153 = tpu.matmul %1, %152, %cst_110 {dimension_numbers = #tpu.dot_dimension_numbers<[1], [0], [0], [1], [0, 0, 1, 1], [], []>} : vector<8x32xf32>, vector<32x8xf32>, vector<8x8xf32> -> vector<8x8xf32>
    %c3_111 = arith.constant 3 : index
    %c0_112 = arith.constant 0 : index
    %c0_113 = arith.constant 0 : index
    %154 = vector.load %arg7[%c3_111, %c0_112, %c0_113] : memref<4x1x8xf32, #tpu.memory_space<vmem>>, vector<1x1x8xf32>
    %155 = vector.shape_cast %154 : vector<1x1x8xf32> to vector<1x8xf32>
    %156 = vector.broadcast %155 : vector<1x8xf32> to vector<8x8xf32>
    %157 = arith.addf %153, %156 : vector<8x8xf32>
    %c3_114 = arith.constant 3 : index
    %c0_115 = arith.constant 0 : index
    %c0_116 = arith.constant 0 : index
    %158 = vector.load %arg8[%c3_114, %c0_115, %c0_116] : memref<4x32x8xf32, #tpu.memory_space<vmem>>, vector<1x32x8xf32>
    %159 = vector.shape_cast %158 : vector<1x32x8xf32> to vector<32x8xf32>
    %cst_117 = arith.constant dense<0.000000e+00> : vector<8x8xf32>
    %160 = tpu.matmul %3, %159, %cst_117 {dimension_numbers = #tpu.dot_dimension_numbers<[1], [0], [0], [1], [0, 0, 1, 1], [], []>} : vector<8x32xf32>, vector<32x8xf32>, vector<8x8xf32> -> vector<8x8xf32>
    %c3_118 = arith.constant 3 : index
    %c0_119 = arith.constant 0 : index
    %c0_120 = arith.constant 0 : index
    %161 = vector.load %arg9[%c3_118, %c0_119, %c0_120] : memref<4x1x8xf32, #tpu.memory_space<vmem>>, vector<1x1x8xf32>
    %162 = vector.shape_cast %161 : vector<1x1x8xf32> to vector<1x8xf32>
    %163 = vector.broadcast %162 : vector<1x8xf32> to vector<8x8xf32>
    %164 = arith.addf %160, %163 : vector<8x8xf32>
    %c3_121 = arith.constant 3 : index
    %c0_122 = arith.constant 0 : index
    %c0_123 = arith.constant 0 : index
    %165 = vector.load %arg10[%c3_121, %c0_122, %c0_123] : memref<4x32x8xf32, #tpu.memory_space<vmem>>, vector<1x32x8xf32>
    %166 = vector.shape_cast %165 : vector<1x32x8xf32> to vector<32x8xf32>
    %cst_124 = arith.constant dense<0.000000e+00> : vector<8x8xf32>
    %167 = tpu.matmul %5, %166, %cst_124 {dimension_numbers = #tpu.dot_dimension_numbers<[1], [0], [0], [1], [0, 0, 1, 1], [], []>} : vector<8x32xf32>, vector<32x8xf32>, vector<8x8xf32> -> vector<8x8xf32>
    %c3_125 = arith.constant 3 : index
    %c0_126 = arith.constant 0 : index
    %c0_127 = arith.constant 0 : index
    %168 = vector.load %arg11[%c3_125, %c0_126, %c0_127] : memref<4x1x8xf32, #tpu.memory_space<vmem>>, vector<1x1x8xf32>
    %169 = vector.shape_cast %168 : vector<1x1x8xf32> to vector<1x8xf32>
    %170 = vector.broadcast %169 : vector<1x8xf32> to vector<8x8xf32>
    %171 = arith.addf %167, %170 : vector<8x8xf32>
    %cst_128 = arith.constant dense<0.000000e+00> : vector<8x8xf32>
    %172 = tpu.matmul %157, %164, %cst_128 {dimension_numbers = #tpu.dot_dimension_numbers<[1], [1], [0], [0], [0, 0, 1, 0], [], []>} : vector<8x8xf32>, vector<8x8xf32>, vector<8x8xf32> -> vector<8x8xf32>
    %cst_129 = arith.constant 0.353553385 : f32
    %173 = vector.broadcast %cst_129 : f32 to vector<8x8xf32>
    %174 = arith.mulf %172, %173 : vector<8x8xf32>
    %cst_130 = arith.constant -1.000000e+09 : f32
    %175 = vector.broadcast %cst_130 : f32 to vector<8x8xf32>
    %176 = arith.select %17, %174, %175 : vector<8x8xi1>, vector<8x8xf32>
    %cst_131 = arith.constant dense<0xFF800000> : vector<8xf32>
    %177 = vector.multi_reduction <maximumf>, %176, %cst_131 [1] : vector<8x8xf32> to vector<8xf32>
    %178 = vector.shape_cast %177 : vector<8xf32> to vector<8x1xf32>
    %179 = vector.broadcast %178 : vector<8x1xf32> to vector<8x8xf32>
    %180 = arith.subf %176, %179 : vector<8x8xf32>
    %181 = math.exp %180 : vector<8x8xf32>
    %cst_132 = arith.constant dense<0.000000e+00> : vector<8xf32>
    %182 = vector.multi_reduction <add>, %181, %cst_132 [1] : vector<8x8xf32> to vector<8xf32>
    %183 = vector.shape_cast %182 : vector<8xf32> to vector<8x1xf32>
    %184 = tpu.reciprocal %183 {approx = true} : vector<8x1xf32> -> vector<8x1xf32>
    %185 = vector.broadcast %184 : vector<8x1xf32> to vector<8x8xf32>
    %186 = arith.mulf %181, %185 : vector<8x8xf32>
    %cst_133 = arith.constant 0.000000e+00 : f32
    %187 = vector.broadcast %cst_133 : f32 to vector<8x8xf32>
    %188 = arith.select %17, %186, %187 : vector<8x8xi1>, vector<8x8xf32>
    %cst_134 = arith.constant dense<0.000000e+00> : vector<8x8xf32>
    %189 = tpu.matmul %188, %171, %cst_134 {dimension_numbers = #tpu.dot_dimension_numbers<[1], [0], [0], [1], [0, 0, 1, 1], [], []>} : vector<8x8xf32>, vector<8x8xf32>, vector<8x8xf32> -> vector<8x8xf32>
    %c3_135 = arith.constant 3 : index
    %c0_136 = arith.constant 0 : index
    %c0_137 = arith.constant 0 : index
    %190 = vector.load %arg12[%c3_135, %c0_136, %c0_137] : memref<4x8x32xf32, #tpu.memory_space<vmem>>, vector<1x8x32xf32>
    %191 = vector.shape_cast %190 : vector<1x8x32xf32> to vector<8x32xf32>
    %cst_138 = arith.constant dense<0.000000e+00> : vector<8x32xf32>
    %192 = tpu.matmul %189, %191, %cst_138 {dimension_numbers = #tpu.dot_dimension_numbers<[1], [0], [0], [1], [0, 0, 1, 1], [], []>} : vector<8x8xf32>, vector<8x32xf32>, vector<8x32xf32> -> vector<8x32xf32>
    %193 = arith.addf %150, %192 : vector<8x32xf32>
    %c0_139 = arith.constant 0 : index
    %c0_140 = arith.constant 0 : index
    %c0_141 = arith.constant 0 : index
    %194 = vector.load %arg14[%c0_139, %c0_140, %c0_141] : memref<1x8x32xf32, #tpu.memory_space<vmem>>, vector<1x8x32xf32>
    %195 = vector.shape_cast %194 : vector<1x8x32xf32> to vector<8x32xf32>
    %196 = vector.shape_cast %193 : vector<8x32xf32> to vector<1x8x32xf32>
    tpu.vector_store %arg14[%c0_139, %c0_140, %c0_141], %196 {strides = array<i32>} : memref<1x8x32xf32, #tpu.memory_space<vmem>>, vector<1x8x32xf32>,
    return
  }
  func.func @transform_0(%arg0: i32, %arg1: i32) -> (i32, i32, i32) {
    %c0_i32 = arith.constant 0 : i32
    %c0_i32_0 = arith.constant 0 : i32
    return %arg0, %arg1, %c0_i32 : i32, i32, i32
  }
  func.func @transform_1(%arg0: i32, %arg1: i32) -> (i32, i32, i32) {
    %c0_i32 = arith.constant 0 : i32
    %c0_i32_0 = arith.constant 0 : i32
    %c0_i32_1 = arith.constant 0 : i32
    return %arg0, %c0_i32, %c0_i32_0 : i32, i32, i32
  }
  func.func @transform_2(%arg0: i32, %arg1: i32) -> (i32, i32, i32) {
    %c0_i32 = arith.constant 0 : i32
    %c0_i32_0 = arith.constant 0 : i32
    %c0_i32_1 = arith.constant 0 : i32
    return %arg0, %c0_i32, %c0_i32_0 : i32, i32, i32
  }
  func.func @transform_3(%arg0: i32, %arg1: i32) -> (i32, i32, i32) {
    %c0_i32 = arith.constant 0 : i32
    %c0_i32_0 = arith.constant 0 : i32
    %c0_i32_1 = arith.constant 0 : i32
    return %arg0, %c0_i32, %c0_i32_0 : i32, i32, i32
  }
  func.func @transform_4(%arg0: i32, %arg1: i32) -> (i32, i32, i32) {
    %c0_i32 = arith.constant 0 : i32
    %c0_i32_0 = arith.constant 0 : i32
    %c0_i32_1 = arith.constant 0 : i32
    %c0_i32_2 = arith.constant 0 : i32
    return %c0_i32, %c0_i32_0, %c0_i32_1 : i32, i32, i32
  }
  func.func @transform_5(%arg0: i32, %arg1: i32) -> (i32, i32, i32) {
    %c0_i32 = arith.constant 0 : i32
    %c0_i32_0 = arith.constant 0 : i32
    %c0_i32_1 = arith.constant 0 : i32
    %c0_i32_2 = arith.constant 0 : i32
    return %c0_i32, %c0_i32_0, %c0_i32_1 : i32, i32, i32
  }
  func.func @transform_6(%arg0: i32, %arg1: i32) -> (i32, i32, i32) {
    %c0_i32 = arith.constant 0 : i32
    %c0_i32_0 = arith.constant 0 : i32
    %c0_i32_1 = arith.constant 0 : i32
    %c0_i32_2 = arith.constant 0 : i32
    return %c0_i32, %c0_i32_0, %c0_i32_1 : i32, i32, i32
  }
  func.func @transform_7(%arg0: i32, %arg1: i32) -> (i32, i32, i32) {
    %c0_i32 = arith.constant 0 : i32
    %c0_i32_0 = arith.constant 0 : i32
    %c0_i32_1 = arith.constant 0 : i32
    %c0_i32_2 = arith.constant 0 : i32
    return %c0_i32, %c0_i32_0, %c0_i32_1 : i32, i32, i32
  }
  func.func @transform_8(%arg0: i32, %arg1: i32) -> (i32, i32, i32) {
    %c0_i32 = arith.constant 0 : i32
    %c0_i32_0 = arith.constant 0 : i32
    %c0_i32_1 = arith.constant 0 : i32
    %c0_i32_2 = arith.constant 0 : i32
    return %c0_i32, %c0_i32_0, %c0_i32_1 : i32, i32, i32
  }
  func.func @transform_9(%arg0: i32, %arg1: i32) -> (i32, i32, i32) {
    %c0_i32 = arith.constant 0 : i32
    %c0_i32_0 = arith.constant 0 : i32
    %c0_i32_1 = arith.constant 0 : i32
    %c0_i32_2 = arith.constant 0 : i32
    return %c0_i32, %c0_i32_0, %c0_i32_1 : i32, i32, i32
  }
  func.func @transform_10(%arg0: i32, %arg1: i32) -> (i32, i32, i32) {
    %c0_i32 = arith.constant 0 : i32
    %c0_i32_0 = arith.constant 0 : i32
    %c0_i32_1 = arith.constant 0 : i32
    %c0_i32_2 = arith.constant 0 : i32
    return %c0_i32, %c0_i32_0, %c0_i32_1 : i32, i32, i32
  }
  func.func @transform_11(%arg0: i32, %arg1: i32) -> (i32, i32) {
    %c0_i32 = arith.constant 0 : i32
    %c0_i32_0 = arith.constant 0 : i32
    %c0_i32_1 = arith.constant 0 : i32
    return %c0_i32, %c0_i32_0 : i32, i32
  }
  func.func @transform_12(%arg0: i32, %arg1: i32) -> (i32, i32, i32) {
    %c0_i32 = arith.constant 0 : i32
    %c0_i32_0 = arith.constant 0 : i32
    return %arg0, %arg1, %c0_i32 : i32, i32, i32
  }
}

</mosaic_0001>

<bundles_post_ra>
// kernel: tpu_custom_call.1
= control target key start
LH: loop header
LB: loop body
LE: loop exit
PB: predicated region body
PF: predicated region fallthrough
CT: control target
= control target key end

     0   :  { %s3754_s0 = inlined_call_operand.vmem [shape: f32[2,8,32], index: 0, kind: input, shape index: {}]   ;;  %s3755_s1 = inlined_call_operand.vmem [shape: f32[2,8,32], index: 1, kind: input, shape index: {}]   ;;  %s3756_s2 = inlined_call_operand.vmem [shape: f32[2,8,32], index: 2, kind: input, shape index: {}]   ;;  %s3757_s3 = inlined_call_operand.vmem [shape: f32[2,1,8], index: 3, kind: input, shape index: {}]   ;;  %s3758_s4 = inlined_call_operand.vmem [shape: f32[4,32,8], index: 4, kind: input, shape index: {}]   ;;  %s3759_s5 = inlined_call_operand.vmem [shape: f32[4,1,8], index: 5, kind: input, shape index: {}]   ;;  %s3760_s6 = inlined_call_operand.vmem [shape: f32[4,32,8], index: 6, kind: input, shape index: {}]   ;;  %s3761_s7 = inlined_call_operand.vmem [shape: f32[4,1,8], index: 7, kind: input, shape index: {}]   ;;  %s3762_s8 = inlined_call_operand.vmem [shape: f32[4,32,8], index: 8, kind: input, shape index: {}]   ;;  %s3763_s9 = inlined_call_operand.vmem [shape: f32[4,1,8], index: 9, kind: input, shape index: {}]   ;;  %s3764_s10 = inlined_call_operand.vmem [shape: f32[4,8,32], index: 10, kind: input, shape index: {}]   ;;  %s3765_s11 = inlined_call_operand.vmem [shape: f32[1,32], index: 11, kind: input, shape index: {}]   ;;  %s3766_s12 = inlined_call_operand.hbm [shape: f32[2,8,32], index: 12, kind: output, shape index: {}]  }
   0x1   :  { %3769 = sst [smem:[#allocation7_spill]] %s3754_s0 }
   0x2   :  { %17 = vsyncpa [#allocation3], 0 }
   0x3   :  { %19 = vsyncpa [#allocation3 + $0x1], 0  ;;  %s3267_s21 = smov 0   ;;  %s3269_s22 = smov 0  }
   0x4   :  { %s3271_s23 = smov 0   ;;  %s3273_s24 = smov 0  }
   0x5   :  { %s3275_s25 = smov 0   ;;  %s3277_s26 = smov 0  }
   0x6 LB: > { %3770 = sst [smem:[#allocation5_spill]] %s3191_s25  ;;  %s2586_s27 = sadd.s32 4294967295, %s3195_s26   ;;  %s3195_s26 = sphi %s3277_s26, %s25_s26   ;;  %s3191_s25 = sphi %s3275_s25, %s3778_s25   ;;  %s3187_s24 = sphi %s3273_s24, %s3777_s24   ;;  %s3183_s23 = sphi %s3271_s23, %s3781_s23   ;;  %s3179_s22 = sphi %s3269_s22, %s3780_s22   ;;  %s3175_s21 = sphi %s3267_s21, %s3779_s21  }
   0x7   : > { %s2587_s28 = sadd.s32 4294967294, %s3195_s26   ;;  %s37_s29 = sadd.s32 1, %s3191_s25 }
   0x8   : > { %s320_s30 = sadd.s32 1, %s3183_s23  ;;  %p39_p0 = scmp.ge.s32.totalorder %s37_s29, 2 }
   0x9   : > { %p330_p1 = scmp.ne.s32.totalorder %s3183_s23, %s3179_s22  ;;  %p331_p2 = scmp.eq.s32.totalorder %s2586_s27, 1 }
   0xa   : > { %p336_p3 = scmp.ne.s32.totalorder %s3179_s22, %s3175_s21  ;;  %s3783_s29 = smov (%p39_p0, %s37_s29), 0 }
   0xb   : > { %3771 = sst [smem:[#allocation6_spill]] %s3783_s29  ;;  %p3307_p4 = por %p331_p2, %p330_p1 }
   0xc   : > { %p337_p5 = scmp.eq.s32.totalorder %s2587_s28, 1  ;;  %s315_s14 = ssub.s32 %s3191_s25, %s3783_s29 }
   0xd   : > { %p2590_p6 = scmp.ge.s32.totalorder %s3195_s26, 1  ;;  %p318_p7 = scmp.eq.s32.totalorder %s315_s14, 0 }
   0xe   : > { %p3314_p8 = por %p337_p5, %p336_p3  ;;  %p409_p9 = scmp.lt.s32.totalorder %s3195_s26, 3 }
   0xf   : > { %s3320_s16 = scalar_select %p318_p7, %s3183_s23, %s320_s30  }
  0x10   : > { %p410_p10 = pnand %p2590_p6, %p409_p9 }
  0x11   : > { %v595_v0 = vld [vmem:[%s3760_s6] sm:$0xff] (!%p410_p10)  ;;  %v596_v1 = vld [vmem:[%s3760_s6 + $0x8] sm:$0xff] (!%p410_p10)  ;;  %v3197_v3 = vmov (!%p410_p10), 0.0|0.0   ;;  %v597_v6 = vld [vmem:[%s3760_s6 + $0x10] sm:$0xff] (!%p410_p10)  ;;  %p464_p11 = scmp.lt.s32.totalorder (!%p410_p10), %s3187_s24, 1  ;;  %vm3198_vm0 = vmmov (!%p410_p10), 0   ;;  %v486_v31 = vlaneseq (!%p410_p10) }
  0x12   : > { %413 = sbr.rel (%p410_p10) target bundleno = 4115 (0x1013), region = 68  ;;  %v510_v2 = vld [vmem:[%s3758_s4] sm:$0xff] (!%p410_p10)  ;;  %2970 = vmatprep.subr.bf16.mxu1 (!%p410_p10), %v3197_v3  ;;  %v2971_v4 = vpack.c.bf16 (!%p410_p10), %v596_v1, %v595_v0  ;;  %2964 = vmatprep.subr.bf16.mxu0 (!%p410_p10), %v3197_v3  ;;  %v511_v5 = vld [vmem:[%s3758_s4 + $0x8] sm:$0xff] (!%p410_p10)  ;;  %v598_v7 = vld [vmem:[%s3760_s6 + $0x18] sm:$0xff] (!%p410_p10)  ;;  %v3199_v11 = vmov (!%p410_p10), 0.0   ;;  %s3774_s0 = sld [smem:[#allocation7_spill]] (!%p410_p10) }
  0x13   : > { %v2965_v8 = vpack.c.bf16 (!%p410_p10), %v511_v5, %v510_v2  ;;  %v512_v9 = vld [vmem:[%s3758_s4 + $0x10] sm:$0xff] (!%p410_p10)  ;;  %v513_v10 = vld [vmem:[%s3758_s4 + $0x18] sm:$0xff] (!%p410_p10)  ;;  %2791 = vmatprep.mubr.msk.f32.mxu1 (!%p410_p10), %vm3198_vm0, %v3199_v11  ;;  %2780 = vmatprep.mubr.msk.f32.mxu0 (!%p410_p10), %vm3198_vm0, %v3199_v11  ;;  %v2974_v12 = vpack.c.bf16 (!%p410_p10), %v598_v7, %v597_v6  ;;  %vm521_vm1 = vcmask (!%p410_p10), 261120   ;;  %v2598_v16 = vld [vmem:[%s3761_s7] ss:$0 sm:$0xff] (!%p410_p10)  ;;  %vm763_vm2 = vcmask (!%p410_p10), 64512  }
  0x14   : > { %2972 = vmatpush3.bf16.msra.mxu1 (!%p410_p10), %v2971_v4  ;;  %v2968_v13 = vpack.c.bf16 (!%p410_p10), %v513_v10, %v512_v9  ;;  %v2596_v17 = vld [vmem:[%s3759_s5] ss:$0 sm:$0xff] (!%p410_p10)  ;;  %v680_v25 = vld [vmem:[%s3762_s8 + $0x8] sm:$0xff] (!%p410_p10)  ;;  %v681_v26 = vld [vmem:[%s3762_s8 + $0x10] sm:$0xff] (!%p410_p10)  ;;  %v487_v33 = vshrl.u32 (!%p410_p10), %v486_v31, 7  ;;  %v3200_v35 = vmov (!%p410_p10), 0  }
  0x15   : > { %2966 = vmatpush3.bf16.msra.mxu0 (!%p410_p10), %v2965_v8  ;;  %2973 = vmatprep.subr.bf16.mxu1 (!%p410_p10), %v3197_v3  ;;  %v679_v24 = vld [vmem:[%s3762_s8] sm:$0xff] (!%p410_p10)  ;;  %v682_v28 = vld [vmem:[%s3762_s8 + $0x18] sm:$0xff] (!%p410_p10)  ;;  %v491_v37 = vand.u32 (!%p410_p10), 127, %v486_v31  ;;  %v2614_v55 = vld [vmem:[%s3760_s6 + $0x28] sm:$0xff] (!%p410_p10)  ;;  %s2685_s14 = sshll.u32 (!%p410_p10), %s3187_s24, 7 }
  0x16   : > { %2967 = vmatprep.subr.bf16.mxu0 (!%p410_p10), %v3197_v3  ;;  %v2977_v27 = vpack.c.bf16 (!%p410_p10), %v680_v25, %v679_v24  ;;  %v2980_v29 = vpack.c.bf16 (!%p410_p10), %v682_v28, %v681_v26  ;;  %v498_v34 = vsub.s32 (!%p410_p10), 0, %v487_v33  ;;  %v2600_v50 = vld [vmem:[%s3763_s9] ss:$0 sm:$0xff] (!%p410_p10)  ;;  %v2615_v62 = vld [vmem:[%s3760_s6 + $0x30] sm:$0xff] (!%p410_p10)  ;;  %v2616_v63 = vld [vmem:[%s3760_s6 + $0x38] sm:$0xff] (!%p410_p10) }
  0x17   : > { %vm492_vm4 = vcmp.le.s32.totalorder (!%p410_p10), %v491_v37, %v487_v33  ;;  %v2613_v54 = vld [vmem:[%s3760_s6 + $0x20] sm:$0xff] (!%p410_p10)  ;;  %v2992_v0 = vpack.c.bf16 (!%p410_p10), %v2616_v63, %v2615_v62  ;;  %v2607_v2 = vld [vmem:[%s3758_s4 + $0x28] sm:$0xff] (!%p410_p10)  ;;  %v2608_v5 = vld [vmem:[%s3758_s4 + $0x30] sm:$0xff] (!%p410_p10) }
  0x18   : > { %2975 = vmatpush3.bf16.msra.mxu1 (!%p410_p10), %v2974_v12  ;;  %v2989_v56 = vpack.c.bf16 (!%p410_p10), %v2614_v55, %v2613_v54  ;;  %v927_v60 = vld [vmem:[%s3764_s10] sm:$0xff] (!%p410_p10)  ;;  %v2609_v6 = vld [vmem:[%s3758_s4 + $0x38] sm:$0xff] (!%p410_p10)  ;;  %v2621_v24 = vld [vmem:[%s3762_s8 + $0x28] sm:$0xff] (!%p410_p10) }
  0x19   : > { %s3354_s30 = scalar_select %p464_p11, %s3187_s24, 1  ;;  %2969 = vmatpush3.bf16.msra.mxu0 %v2968_v13  ;;  %2805 = vmatprep.subr.mxu1 %v3199_v11  ;;  %v2606_v1 = vld [vmem:[%s3758_s4 + $0x20] sm:$0xff]  ;;  %v2986_v9 = vpack.c.bf16 %v2609_v6, %v2608_v5  ;;  %v2622_v25 = vld [vmem:[%s3762_s8 + $0x30] sm:$0xff]  ;;  %v2635_v54 = vld [vmem:[%s3758_s4 + $0x58] sm:$0xff] }
  0x1a   : > { %2976 = vmatprep.subr.bf16.mxu0 %v3197_v3  ;;  %v2983_v4 = vpack.c.bf16 %v2607_v2, %v2606_v1  ;;  %v2618_v10 = vld [vmem:[%s3761_s7 + $0x1] ss:$0 sm:$0xff]  ;;  %v2644_v2 = vld [vmem:[%s3761_s7 + $0x2] ss:$0 sm:$0xff] }
  0x1b   : > { %s3359_s25 = sshll.u32 %s3354_s30, 3  ;;  %s481_s27 = scalar_lea.vmem %s3757_s3, %s3354_s30 }
  0x1c   : > { %s474_s17 = scalar_lea.vmem %s3755_s1, %s3359_s25  ;;  %s470_s20 = scalar_lea.vmem %s3774_s0, %s3359_s25  ;;  %v493_v32 = vld [vmem:[%s481_s27] sm:$0x1] }
  0x1d   : > { %v3369_v14 = vld [vmem:[%s474_s17] sm:$0xff]  ;;  %s478_s18 = scalar_lea.vmem %s3756_s2, %s3359_s25  ;;  %vm494_vm3 = vcmp.gt.f32.partialorder %v493_v32, 0.5  ;;  %s461_s30 = sand.u32 1, %s3179_s22  }
  0x1e   : > { %v3371_v15 = vld [vmem:[%s470_s20] sm:$0xff]  ;;  %2792 = vmatmul.mubr.msk.f32.vlgmr.msra.gmra.mrb[0].mxu1 %vm521_vm1, %v3369_v14  ;;  %v495_v36 = vsel %vm494_vm3, 1, %v3200_v35  ;;  %s2591_s25 = sshll.u32 %s461_s30, 3  ;;  %s3706_s27 = scalar_lea.hbm %s3766_s12, %s2685_s14 }
  0x1f   : > { %2781 = vmatmul.mubr.msk.f32.vlgmr.msra.gmra.mrb[0].mxu0 %vm521_vm1, %v3371_v15  ;;  %2807 = vmatprep.mubr.msk.f32.mxu1 %vm3198_vm0, %v3199_v11  ;;  %v3411_v30 = vld [vmem:[%s478_s18] sm:$0xff]  ;;  %v499_v38 = vrot.slane %v495_v36, %v498_v34  ;;  %s463_s17 = scalar_lea.vmem [#allocation2], %s2591_s25  ;;  %s2468_s24 = scalar_lea.sflag [#allocation3], %s461_s30 }
  0x20   : > { %2802 = vmatprep.mubr.msk.f32.mxu0 %vm3198_vm0, %v3199_v11  ;;  %2978 = vmatpush3.bf16.msra.mxu0 %v2977_v27  ;;  %v2623_v27 = vld [vmem:[%s3762_s8 + $0x38] sm:$0xff]  ;;  %s2482_s18 = sshll.u32 %s463_s17, 4  ;;  %s3201_s25 = smov [#allocation2]   ;;  %s3708_s18 = int_to_ptr.vmem [resolvable:$true] %s2482_s18 }
  0x21   : > { %2979 = vmatprep.subr.bf16.mxu0 %v3197_v3  ;;  %vm500_vm5 = vcmp.eq.s32.totalorder %v499_v38, 1  ;;  %v2998_v28 = vpack.c.bf16 %v2623_v27, %v2622_v25  ;;  %s3117_s0 = scalar_lea.vmem %s3708_s18, 128  ;;  %s3121_s28 = sshll.u32 %s3201_s25, 4  ;;  %s3122_s28 = int_to_ptr.vmem [resolvable:$false] %s3121_s28 }
  0x22   : > { %vm3422_vm6 = vmand %vm492_vm4, %vm500_vm5  ;;  %p3118_p12 = scmp.ne.s32.totalorder %s3708_s18, %s3117_s0  ;;  %s3123_s29 = scalar_lea.vmem %s3122_s28, 256 }
  0x23   : > { %p3124_p1 = scmp.lt.s32.totalorder %s3708_s18, %s3122_s28  ;;  %p3125_p2 = scmp.lt.s32.totalorder %s3123_s29, %s3117_s0 }
  0x24   : > { %2981 = vmatpush3.bf16.msra.mxu0 %v2980_v29  ;;  %p3119_p13 = pnand %p3118_p12, %p3307_p4 }
  0x25   : > { %2988 = vmatprep.subr.bf16.mxu0 %v3197_v3  ;;  %p3126_p3 = por %p3125_p2, %p3124_p1 }
  0x26   : > { %p3120_p0 = pneg %p3119_p13 }
  0x27   : > { %2803 = vmatmul.mubr.msk.f32.vlgmr.msra.gmra.mrb[2].mxu0 %vm521_vm1, %v3411_v30 }
  0x28   : > { %2839 = vmatprep.mubr.msk.f32.mxu0 %vm3198_vm0, %v3199_v11  ;;  %2990 = vmatpush3.bf16.msra.mxu0 %v2989_v56  ;;  %v2639_v56 = vld [vmem:[%s3760_s6 + $0x40] sm:$0xff]  ;;  %p3127_p5 = pnand %p3126_p3, %p3120_p0 }
  0x29   : > { %2991 = vmatprep.subr.bf16.mxu0 %v3197_v3 }
  0x2c   : > { %2993 = vmatpush3.bf16.msra.mxu0 %v2992_v0 }
  0x2d   : > { %2853 = vmatprep.subr.mxu0 %v3199_v11 }
  0x2f   : > { %2840 = vmatmul.mubr.msk.f32.vlgmr.msra.gmra.mrb[4].mxu0 %vm521_vm1, %v3369_v14 }
  0x30   : > { %2855 = vmatprep.mubr.msk.f32.mxu0 %vm3198_vm0, %v3199_v11 }
  0xf1   : > { %v675_v18 = vpop.f32.mrb[0].mxu1 }
  0xf2   : > { %v676_v19 = vadd.f32 %v2598_v16, %v675_v18  ;;  %v2793_v20 = vpop.f32.mrb[1].mxu1  ;;  %v591_v21 = vpop.f32.mrb[0].mxu0 }
  0xf3   : > { %v592_v22 = vadd.f32 %v2596_v17, %v591_v21  ;;  %v2782_v23 = vpop.f32.mrb[1].mxu0 }
  0xf4   : > { %2806 = vmatpush3.xpose.msk.msra.mxu1 %vm763_vm2, %v676_v19  ;;  %v2611_v19 = vld [vmem:[%s3759_s5 + $0x1] ss:$0 sm:$0xff] }
  0xf5   : > { %2810 = vmatprep.subr.mxu1 %v3199_v11  ;;  %v2620_v23 = vld [vmem:[%s3762_s8 + $0x20] sm:$0xff] }
  0xf6   : > { %v2995_v26 = vpack.c.bf16 %v2621_v24, %v2620_v23 }
  0xf7   : > { %2808 = vmatmul.mubr.msk.f32.vlgmr.msra.gmra.mrb[2].mxu1 %vm763_vm2, %v592_v22 }
  0xf8   : > { %2812 = vmatprep.mubr.msk.f32.mxu1 %vm3198_vm0, %v3199_v11 }
  0xfa   : > { %v759_v51 = vpop.f32.mrb[2].mxu0 }
  0xfb   : > { %v760_v52 = vadd.f32 %v2600_v50, %v759_v51  ;;  %v2804_v53 = vpop.f32.mrb[3].mxu0  ;;  %v2632_v50 = vld [vmem:[%s3758_s4 + $0x40] sm:$0xff]  ;;  %v2633_v51 = vld [vmem:[%s3758_s4 + $0x48] sm:$0xff] }
  0xfc   : > { %v2634_v53 = vld [vmem:[%s3758_s4 + $0x50] sm:$0xff] }
  0xfd   : > { %2811 = vmatpush3.msra.mxu1 %v760_v52  ;;  %v3001_v52 = vpack.c.bf16 %v2633_v51, %v2632_v50  ;;  %v3004_v55 = vpack.c.bf16 %v2635_v54, %v2634_v53 }
  0xfe   : > { %2815 = vmatprep.subr.mxu1 %v3199_v11 }
 0x102   : > { %v1164_v12 = vpop.f32.mrb[4].mxu0 }
 0x103   : > { %v1165_v13 = vadd.f32 %v2618_v10, %v1164_v12  ;;  %v2841_v16 = vpop.f32.mrb[5].mxu0  ;;  %v2647_v10 = vld [vmem:[%s3762_s8 + $0x48] sm:$0xff]  ;;  %v2648_v12 = vld [vmem:[%s3762_s8 + $0x50] sm:$0xff] }
 0x104   : > { %v2649_v16 = vld [vmem:[%s3762_s8 + $0x58] sm:$0xff] }
 0x105   : > { %2854 = vmatpush3.xpose.msk.msra.mxu0 %vm763_vm2, %v1165_v13 }
 0x106   : > { %2858 = vmatprep.subr.mxu0 %v3199_v11 }
 0x1ca   : > { %v836_v40 = vpop.f32.mrb[2].mxu1 }
 0x1cb   : > { %v840_v41 = vmul.f32 0.35355338, %v836_v40  ;;  %v2809_v42 = vpop.f32.mrb[3].mxu1 }
 0x1cd   : > { %v841_v43 = vsel %vm3422_vm6, %v840_v41, -1e+09  ;;  %v2625_v41 = vld [vmem:[%s3763_s9 + $0x1] ss:$0 sm:$0xff] }
 0x1ce   : > { %v842_v44 = vsel %vm763_vm2, %v841_v43, -inf }
 0x1cf   : > { %843 = vmax.xlane.f32.xlu0 %v842_v44 }
 0x25c   : > { %v844_v45 = vpop.xlane.xlu0 %843 }
 0x25d   : > { %v845_v46 = vsub.f32 %v841_v43, %v844_v45 }
 0x25f   : > { %v846_v47 = vmul.f32 1.442695, %v845_v46 }
 0x261   : > { %3101 = vpow2.f32 %v846_v47 }
 0x26b   : > { %v3102_v48 = vpop.eup %3101 }
 0x26c   : > { %v848_v49 = vsel %vm763_vm2, %v3102_v48, 0.0 }
 0x26d   : > { %849 = vadd.xlane.f32.xlu0 %v848_v49 }
 0x2fa   : > { %v850_v57 = vpop.xlane.xlu0 %849 }
 0x2fb   : > { %3103 = vrcp.f32 %v850_v57  ;;  %v2640_v57 = vld [vmem:[%s3760_s6 + $0x48] sm:$0xff] }
 0x305   : > { %v3104_v58 = vpop.eup %3103 }
 0x306   : > { %v852_v59 = vmul.f32 %v3104_v58, %v3102_v48  ;;  %v2630_v48 = vld [vmem:[%s3764_s10 + $0x8] sm:$0xff]  ;;  %v3007_v58 = vpack.c.bf16 %v2640_v57, %v2639_v56  ;;  %v2663_v56 = vld [vmem:[%s3759_s5 + $0x3] ss:$0 sm:$0xff] }
 0x308   : > { %v853_v61 = vsel %vm3422_vm6, %v852_v59, 0.0  ;;  %v2641_v59 = vld [vmem:[%s3760_s6 + $0x50] sm:$0xff] }
 0x309   : > { %2813 = vmatmul.mubr.msk.f32.vlgmr.msra.gmra.mrb[4].mxu1 %vm763_vm2, %v853_v61 }
 0x30a   : > { %2816 = vmatpush3.msra.mxu1 %v927_v60  ;;  %2817 = vmatprep.mubr.msk.f32.mxu1 %vm3198_vm0, %v3199_v11  ;;  %v2642_v60 = vld [vmem:[%s3760_s6 + $0x58] sm:$0xff] }
 0x30b   : > { %2982 = vmatprep.subr.bf16.mxu1 %v3197_v3  ;;  %v3010_v63 = vpack.c.bf16 %v2642_v60, %v2641_v59 }
 0x3dc   : > { %v923_v7 = vpop.f32.mrb[4].mxu1 }
 0x3dd   : > { %v2814_v8 = vpop.f32.mrb[5].mxu1  ;;  %2818 = vmatmul.mubr.msk.f32.vlgmr.msra.gmra.mrb[6].mxu1 %vm763_vm2, %v923_v7 }
 0x3de   : > { %2984 = vmatpush3.bf16.msra.mxu1 %v2983_v4  ;;  %2828 = vmatprep.mubr.msk.f32.mxu1 %vm3198_vm0, %v3199_v11  ;;  %v2637_v4 = vld [vmem:[%s3759_s5 + $0x2] ss:$0 sm:$0xff] }
 0x3df   : > { %2985 = vmatprep.subr.bf16.mxu1 %v3197_v3 }
 0x3e2   : > { %2987 = vmatpush3.bf16.msra.mxu1 %v2986_v9  ;;  %v2646_v9 = vld [vmem:[%s3762_s8 + $0x40] sm:$0xff] }
 0x3e3   : > { %2994 = vmatprep.subr.bf16.mxu1 %v3197_v3  ;;  %v3013_v13 = vpack.c.bf16 %v2647_v10, %v2646_v9 }
 0x3e5   : > { %2829 = vmatmul.mubr.msk.f32.vlgmr.msra.gmra.mrb[8].mxu1 %vm521_vm1, %v3371_v15 }
 0x3e6   : > { %2850 = vmatprep.mubr.msk.f32.mxu1 %vm3198_vm0, %v3199_v11  ;;  %2996 = vmatpush3.bf16.msra.mxu1 %v2995_v26 }
 0x3e7   : > { %2997 = vmatprep.subr.bf16.mxu1 %v3197_v3 }
 0x3ea   : > { %2999 = vmatpush3.bf16.msra.mxu1 %v2998_v28 }
 0x3eb   : > { %3000 = vmatprep.subr.bf16.mxu1 %v3197_v3 }
 0x3ed   : > { %2851 = vmatmul.mubr.msk.f32.vlgmr.msra.gmra.mrb[10].mxu1 %vm521_vm1, %v3411_v30 }
 0x3ee   : > { %2876 = vmatprep.mubr.msk.f32.mxu1 %vm3198_vm0, %v3199_v11  ;;  %3002 = vmatpush3.bf16.msra.mxu1 %v3001_v52 }
 0x3ef   : > { %3003 = vmatprep.subr.bf16.mxu1 %v3197_v3 }
 0x3f2   : > { %3005 = vmatpush3.bf16.msra.mxu1 %v3004_v55  ;;  %v2670_v55 = vld [vmem:[%s3761_s7 + $0x3] ss:$0 sm:$0xff] }
 0x3f3   : > { %3012 = vmatprep.subr.bf16.mxu1 %v3197_v3 }
 0x3f5   : > { %2877 = vmatmul.mubr.msk.f32.vlgmr.msra.gmra.mrb[12].mxu1 %vm521_vm1, %v3371_v15 }
 0x3f6   : > { %2898 = vmatprep.mubr.msk.f32.mxu1 %vm3198_vm0, %v3199_v11  ;;  %3014 = vmatpush3.bf16.msra.mxu1 %v3013_v13 }
 0x3f7   : > { %3015 = vmatprep.subr.bf16.mxu1 %v3197_v3 }
 0x4b0   : > { %v3487_v17 = vpop.f32.mrb[6].mxu1 }
 0x4b1   : > { %v2819_v18 = vpop.f32.mrb[7].mxu1 }
 0x4b2   : > { %v3016_v18 = vpack.c.bf16 %v2649_v16, %v2648_v12 }
 0x4b4   : > { %3017 = vmatpush3.bf16.msra.mxu1 %v3016_v18 }
 0x4b5   : > { %2906 = vmatprep.subr.mxu1 %v3199_v11 }
 0x4b7   : > { %2899 = vmatmul.mubr.msk.f32.vlgmr.msra.gmra.mrb[14].mxu1 %vm521_vm1, %v3411_v30 }
 0x4b8   : > { %v1081_v20 = vpop.f32.mrb[8].mxu1  ;;  %2908 = vmatprep.mubr.msk.f32.mxu1 %vm3198_vm0, %v3199_v11 }
 0x4b9   : > { %v1082_v21 = vadd.f32 %v2611_v19, %v1081_v20  ;;  %v2830_v22 = vpop.f32.mrb[9].mxu1 }
 0x4bb   : > { %2856 = vmatmul.mubr.msk.f32.vlgmr.msra.gmra.mrb[6].mxu0 %vm763_vm2, %v1082_v21 }
 0x4bc   : > { %2860 = vmatprep.mubr.msk.f32.mxu0 %vm3198_vm0, %v3199_v11 }
 0x4c0   : > { %v1247_v42 = vpop.f32.mrb[10].mxu1 }
 0x4c1   : > { %v1248_v43 = vadd.f32 %v2625_v41, %v1247_v42  ;;  %v2852_v44 = vpop.f32.mrb[11].mxu1  ;;  %v2659_v41 = vld [vmem:[%s3758_s4 + $0x68] sm:$0xff] }
 0x4c2   : > { %v2661_v44 = vld [vmem:[%s3758_s4 + $0x78] sm:$0xff] }
 0x4c3   : > { %2859 = vmatpush3.msra.mxu0 %v1248_v43  ;;  %v2660_v43 = vld [vmem:[%s3758_s4 + $0x70] sm:$0xff] }
 0x4c4   : > { %2863 = vmatprep.subr.mxu0 %v3199_v11 }
 0x4c8   : > { %v1569_v0 = vpop.f32.mrb[12].mxu1 }
 0x4c9   : > { %v2878_v1 = vpop.f32.mrb[13].mxu1  ;;  %v1570_v8 = vadd.f32 %v2637_v4, %v1569_v0  ;;  %v2675_v0 = vld [vmem:[%s3762_s8 + $0x78] sm:$0xff] }
 0x58e   : > { %v1323_v29 = vpop.f32.mrb[6].mxu0 }
 0x58f   : > { %v1327_v31 = vmul.f32 0.35355338, %v1323_v29  ;;  %v2857_v32 = vpop.f32.mrb[7].mxu0  ;;  %v2651_v29 = vld [vmem:[%s3763_s9 + $0x2] ss:$0 sm:$0xff] }
 0x591   : > { %v1328_v33 = vsel %vm3422_vm6, %v1327_v31, -1e+09  ;;  %v1735_v31 = vpop.f32.mrb[14].mxu1 }
 0x592   : > { %v1329_v34 = vsel %vm763_vm2, %v1328_v33, -inf  ;;  %v1736_v32 = vadd.f32 %v2651_v29, %v1735_v31 }
 0x593   : > { %1330 = vmax.xlane.f32.xlu1 %v1329_v34  ;;  %v2656_v34 = vld [vmem:[%s3764_s10 + $0x10] sm:$0xff] }
 0x594   : > { %2907 = vmatpush3.msra.mxu1 %v1736_v32 }
 0x595   : > { %3018 = vmatprep.subr.bf16.mxu1 %v3197_v3 }
 0x620   : > { %v1331_v35 = vpop.xlane.xlu1 %1330 }
 0x621   : > { %v1332_v36 = vsub.f32 %v1328_v33, %v1331_v35  ;;  %v2900_v33 = vpop.f32.mrb[15].mxu1 }
 0x623   : > { %v1333_v37 = vmul.f32 1.442695, %v1332_v36 }
 0x625   : > { %3105 = vpow2.f32 %v1333_v37 }
 0x62f   : > { %v3106_v38 = vpop.eup %3105 }
 0x630   : > { %v1335_v40 = vsel %vm763_vm2, %v3106_v38, 0.0 }
 0x631   : > { %1336 = vadd.xlane.f32.xlu1 %v1335_v40  ;;  %v2658_v40 = vld [vmem:[%s3758_s4 + $0x60] sm:$0xff] }
 0x632   : > { %v3019_v42 = vpack.c.bf16 %v2659_v41, %v2658_v40 }
 0x6be   : > { %v1337_v45 = vpop.xlane.xlu1 %1336 }
 0x6bf   : > { %3107 = vrcp.f32 %v1337_v45  ;;  %v3022_v45 = vpack.c.bf16 %v2661_v44, %v2660_v43 }
 0x6c9   : > { %v3108_v46 = vpop.eup %3107 }
 0x6ca   : > { %v1339_v47 = vmul.f32 %v3108_v46, %v3106_v38  ;;  %v2665_v46 = vld [vmem:[%s3760_s6 + $0x60] sm:$0xff] }
 0x6cc   : > { %v1340_v49 = vsel %vm3422_vm6, %v1339_v47, 0.0  ;;  %v2666_v47 = vld [vmem:[%s3760_s6 + $0x68] sm:$0xff] }
 0x6cd   : > { %2861 = vmatmul.mubr.msk.f32.vlgmr.msra.gmra.mrb[8].mxu0 %vm763_vm2, %v1340_v49  ;;  %v2667_v49 = vld [vmem:[%s3760_s6 + $0x70] sm:$0xff] }
 0x6ce   : > { %2864 = vmatpush3.msra.mxu0 %v2630_v48  ;;  %2865 = vmatprep.mubr.msk.f32.mxu0 %vm3198_vm0, %v3199_v11  ;;  %v3025_v48 = vpack.c.bf16 %v2666_v47, %v2665_v46 }
 0x6cf   : > { %3006 = vmatprep.subr.bf16.mxu0 %v3197_v3 }
 0x7a0   : > { %v1410_v61 = vpop.f32.mrb[8].mxu0 }
 0x7a1   : > { %v2862_v62 = vpop.f32.mrb[9].mxu0  ;;  %2866 = vmatmul.mubr.msk.f32.vlgmr.msra.gmra.mrb[10].mxu0 %vm763_vm2, %v1410_v61  ;;  %v2673_v61 = vld [vmem:[%s3762_s8 + $0x68] sm:$0xff] }
 0x7a2   : > { %3008 = vmatpush3.bf16.msra.mxu0 %v3007_v58  ;;  %2887 = vmatprep.mubr.msk.f32.mxu0 %vm3198_vm0, %v3199_v11  ;;  %v2674_v62 = vld [vmem:[%s3762_s8 + $0x70] sm:$0xff] }
 0x7a3   : > { %3009 = vmatprep.subr.bf16.mxu0 %v3197_v3  ;;  %v3034_v1 = vpack.c.bf16 %v2675_v0, %v2674_v62 }
 0x7a6   : > { %3011 = vmatpush3.bf16.msra.mxu0 %v3010_v63 }
 0x7a7   : > { %2901 = vmatprep.subr.mxu0 %v3199_v11 }
 0x7a9   : > { %2888 = vmatmul.mubr.msk.f32.vlgmr.msra.gmra.mrb[12].mxu0 %vm521_vm1, %v3369_v14 }
 0x7aa   : > { %2903 = vmatprep.mubr.msk.f32.mxu0 %vm3198_vm0, %v3199_v11 }
 0x87c   : > { %v1652_v5 = vpop.f32.mrb[12].mxu0 }
 0x87d   : > { %v1653_v6 = vadd.f32 %v2644_v2, %v1652_v5  ;;  %v2889_v7 = vpop.f32.mrb[13].mxu0 }
 0x87f   : > { %2902 = vmatpush3.xpose.msk.msra.mxu0 %vm763_vm2, %v1653_v6 }
 0x880   : > { %2911 = vmatprep.subr.mxu0 %v3199_v11 }
 0x882   : > { %2904 = vmatmul.mubr.msk.f32.vlgmr.msra.gmra.mrb[14].mxu0 %vm763_vm2, %v1570_v8 }
 0x883   : > { %2913 = vmatprep.mubr.msk.f32.mxu0 %vm3198_vm0, %v3199_v11  ;;  %2912 = vmatpush3.msra.mxu0 %v2656_v34 }
 0x884   : > { %3024 = vmatprep.subr.bf16.mxu0 %v3197_v3 }
 0x955   : > { %v1811_v19 = vpop.f32.mrb[14].mxu0 }
 0x956   : > { %v1815_v20 = vmul.f32 0.35355338, %v1811_v19  ;;  %v2905_v21 = vpop.f32.mrb[15].mxu0 }
 0x958   : > { %v1816_v22 = vsel %vm3422_vm6, %v1815_v20, -1e+09 }
 0x959   : > { %v1817_v23 = vsel %vm763_vm2, %v1816_v22, -inf }
 0x95a   : > { %1818 = vmax.xlane.f32.xlu0 %v1817_v23 }
 0x9e7   : > { %v1819_v24 = vpop.xlane.xlu0 %1818 }
 0x9e8   : > { %v1820_v25 = vsub.f32 %v1816_v22, %v1819_v24  ;;  %v2682_v22 = vld [vmem:[%s3764_s10 + $0x18] sm:$0xff] }
 0x9ea   : > { %v1821_v26 = vmul.f32 1.442695, %v1820_v25 }
 0x9ec   : > { %3109 = vpow2.f32 %v1821_v26  ;;  %v2595_v26 = vld [vmem:[%s3765_s11] ss:$0 sm:$0xff] }
 0x9ed   : > { %v1001_v39 = vadd.f32 %v2595_v26, %v3487_v17 }
 0x9f6   : > { %v3110_v27 = vpop.eup %3109 }
 0x9f7   : > { %v1823_v28 = vsel %vm763_vm2, %v3110_v27, 0.0 }
 0x9f8   : > { %1824 = vadd.xlane.f32.xlu1 %v1823_v28 }
 0xa85   : > { %v1825_v35 = vpop.xlane.xlu1 %1824 }
 0xa86   : > { %3111 = vrcp.f32 %v1825_v35 }
 0xa90   : > { %v3112_v36 = vpop.eup %3111 }
 0xa91   : > { %v1827_v37 = vmul.f32 %v3112_v36, %v3110_v27 }
 0xa93   : > { %v1828_v38 = vsel %vm3422_vm6, %v1827_v37, 0.0 }
 0xa94   : > { %2909 = vmatmul.mubr.msk.f32.vlgmr.msra.gmra.mrb[16].mxu1 %vm763_vm2, %v1828_v38 }
 0xa95   : > { %2924 = vmatprep.mubr.msk.f32.mxu1 %vm3198_vm0, %v3199_v11  ;;  %3020 = vmatpush3.bf16.msra.mxu1 %v3019_v42 }
 0xa96   : > { %3021 = vmatprep.subr.bf16.mxu1 %v3197_v3 }
 0xa99   : > { %3023 = vmatpush3.bf16.msra.mxu1 %v3022_v45 }
 0xa9a   : > { %3030 = vmatprep.subr.bf16.mxu1 %v3197_v3 }
 0xa9c   : > { %2925 = vmatmul.mubr.msk.f32.vlgmr.msra.gmra.mrb[18].mxu1 %vm521_vm1, %v3371_v15  ;;  %v2668_v15 = vld [vmem:[%s3760_s6 + $0x78] sm:$0xff] }
 0xa9d   : > { %2946 = vmatprep.mubr.msk.f32.mxu1 %vm3198_vm0, %v3199_v11  ;;  %v3028_v52 = vpack.c.bf16 %v2668_v15, %v2667_v49 }
 0xb67   : > { %v1898_v50 = vpop.f32.mrb[16].mxu1 }
 0xb68   : > { %v2910_v51 = vpop.f32.mrb[17].mxu1  ;;  %2914 = vmatmul.mubr.msk.f32.vlgmr.msra.gmra.mrb[10].mxu0 %vm763_vm2, %v1898_v50 }
 0xb69   : > { %3026 = vmatpush3.bf16.msra.mxu0 %v3025_v48  ;;  %2935 = vmatprep.mubr.msk.f32.mxu0 %vm3198_vm0, %v3199_v11 }
 0xb6a   : > { %3027 = vmatprep.subr.bf16.mxu0 %v3197_v3 }
 0xb6d   : > { %3029 = vmatpush3.bf16.msra.mxu0 %v3028_v52 }
 0xb6e   : > { %2949 = vmatprep.subr.mxu0 %v3199_v11 }
 0xb6f   : > { %v2057_v53 = vpop.f32.mrb[18].mxu1 }
 0xb70   : > { %2936 = vmatmul.mubr.msk.f32.vlgmr.msra.gmra.mrb[16].mxu0 %vm521_vm1, %v3369_v14  ;;  %v2926_v54 = vpop.f32.mrb[19].mxu1  ;;  %v2058_v60 = vadd.f32 %v2663_v56, %v2057_v53  ;;  %v2672_v14 = vld [vmem:[%s3762_s8 + $0x60] sm:$0xff] }
 0xb71   : > { %2951 = vmatprep.mubr.msk.f32.mxu0 %vm3198_vm0, %v3199_v11  ;;  %v3031_v63 = vpack.c.bf16 %v2673_v61, %v2672_v14 }
 0xb73   : > { %3032 = vmatpush3.bf16.msra.mxu1 %v3031_v63 }
 0xb74   : > { %3033 = vmatprep.subr.bf16.mxu1 %v3197_v3 }
 0xb77   : > { %3035 = vmatpush3.bf16.msra.mxu1 %v3034_v1 }
 0xb7a   : > { %2947 = vmatmul.mubr.msk.f32.vlgmr.msra.gmra.mrb[20].mxu1 %vm521_vm1, %v3411_v30  ;;  %v2677_v30 = vld [vmem:[%s3763_s9 + $0x3] ss:$0 sm:$0xff] }
 0xc43   : > { %v2140_v57 = vpop.f32.mrb[16].mxu0 }
 0xc44   : > { %v2141_v58 = vadd.f32 %v2670_v55, %v2140_v57  ;;  %v2937_v59 = vpop.f32.mrb[17].mxu0 }
 0xc46   : > { %2950 = vmatpush3.xpose.msk.msra.mxu0 %vm763_vm2, %v2141_v58 }
 0xc47   : > { %2954 = vmatprep.subr.mxu0 %v3199_v11 }
 0xc49   : > { %2952 = vmatmul.mubr.msk.f32.vlgmr.msra.gmra.mrb[18].mxu0 %vm763_vm2, %v2058_v60 }
 0xc4a   : > { %2956 = vmatprep.mubr.msk.f32.mxu0 %vm3198_vm0, %v3199_v11 }
 0xc4d   : > { %v2223_v13 = vpop.f32.mrb[20].mxu1 }
 0xc4e   : > { %v2224_v16 = vadd.f32 %v2677_v30, %v2223_v13  ;;  %v2948_v18 = vpop.f32.mrb[21].mxu1 }
 0xc50   : > { %2955 = vmatpush3.msra.mxu0 %v2224_v16 }
 0xc51   : > { %2959 = vmatprep.subr.mxu0 %v3199_v11 }
 0xd1c   : > { %v2299_v2 = vpop.f32.mrb[18].mxu0 }
 0xd1d   : > { %v2303_v4 = vmul.f32 0.35355338, %v2299_v2  ;;  %v2953_v5 = vpop.f32.mrb[19].mxu0 }
 0xd1f   : > { %v2304_v6 = vsel %vm3422_vm6, %v2303_v4, -1e+09 }
 0xd20   : > { %v2305_v7 = vsel %vm763_vm2, %v2304_v6, -inf }
 0xd21   : > { %2306 = vmax.xlane.f32.xlu0 %v2305_v7 }
 0xdae   : > { %v2307_v8 = vpop.xlane.xlu0 %2306 }
 0xdaf   : > { %v2308_v9 = vsub.f32 %v2304_v6, %v2307_v8 }
 0xdb1   : > { %v2309_v10 = vmul.f32 1.442695, %v2308_v9 }
 0xdb3   : > { %3113 = vpow2.f32 %v2309_v10 }
 0xdbd   : > { %v3114_v12 = vpop.eup %3113 }
 0xdbe   : > { %v2311_v3 = vsel %vm763_vm2, %v3114_v12, 0.0 }
 0xdbf   : > { %2312 = vadd.xlane.f32.xlu1 %v2311_v3 }
 0xe4c   : > { %v2313_v19 = vpop.xlane.xlu1 %2312 }
 0xe4d   : > { %3115 = vrcp.f32 %v2313_v19 }
 0xe57   : > { %v3116_v20 = vpop.eup %3115 }
 0xe58   : > { %v2315_v21 = vmul.f32 %v3116_v20, %v3114_v12 }
 0xe5a   : > { %v2316_v23 = vsel %vm3422_vm6, %v2315_v21, 0.0 }
 0xe5b   : > { %2957 = vmatmul.mubr.msk.f32.vlgmr.msra.gmra.mrb[20].mxu0 %vm763_vm2, %v2316_v23 }
 0xe5c   : > { %2960 = vmatpush3.msra.mxu0 %v2682_v22  ;;  %2961 = vmatprep.mubr.msk.f32.mxu0 %vm3198_vm0, %v3199_v11 }
 0xf2e   : > { %v2386_v24 = vpop.f32.mrb[20].mxu0 }
 0xf2f   : > { %v2958_v25 = vpop.f32.mrb[21].mxu0  ;;  %2962 = vmatmul.mubr.msk.f32.vlgmr.msra.gmra.mrb[10].mxu0 %vm763_vm2, %v2386_v24 }
0x1002   : > { %v2461_v27 = vpop.f32.mrb[10].mxu0 }
0x1003   : > { %v3037_v28 = vadd.f32 %v2461_v27, %v1001_v39  ;;  %v2963_v29 = vpop.f32.mrb[11].mxu0 }
0x1005   : > { %2466 = vst.msk [vmem:[%s463_s17] sm:$0xff] %vm521_vm1, %v3037_v28 }
0x1006   : > { %3130 = shalt.err (!%p3127_p5)
}
0x1007   : > { %s3131_s30 = scalar_lea.hbm %s3706_s27, 128  ;;  %s3135_s19 = scalar_lea.hbm %s3766_s12, 256 }
0x1008   : > { %p3132_p6 = scmp.ne.s32.totalorder %s3706_s27, %s3131_s30  ;;  %p3136_p10 = scmp.lt.u32.totalorder %s3706_s27, %s3766_s12 }
0x1009   : > { %p3137_p11 = scmp.lt.u32.totalorder %s3135_s19, %s3131_s30  ;;  %p3139_p13 = scmp.lt.u32.totalorder %s3131_s30, %s3706_s27 }
0x100a   : > { %p3133_p7 = pnand %p3132_p6, %p3307_p4 }
0x100b   : > { %p3138_p12 = por %p3137_p11, %p3136_p10 }
0x100c   : > { %p3134_p9 = pneg %p3133_p7 }
0x100d   : > { %p3140_p0 = por %p3139_p13, %p3138_p12 }
0x100f   : > { %p3141_p1 = pnand %p3140_p0, %p3134_p9 }
0x1011   : > { %3144 = shalt.err (!%p3141_p1)
}
0x1012   : > { %3042 = dma.vmem_to_hbm [thread:$0]  (%p3307_p4), %s3708_s18, 128, %s3706_s27, %s2468_s24  }
0x1013 PF: > { %p3048_p2 = scmp.ge.s32.totalorder %s3195_s26, 2  ;;  %s2494_s0 = sand.u32 1, %s3175_s21  }
0x1014   : > { %s2495_s28 = scalar_lea.sflag [#allocation3], %s2494_s0 }
0x1015   : > { %p3045_p3 = pnand %p3048_p2, %p3314_p8 }
0x1017   : > { %3170 = dma.done.wait (!%p3045_p3), %s2495_s28, 128  }
0x1018   : > { %3172 = vsyncadd (!%p3045_p3), %s2495_s28, 4294967168  ;;  %s25_s26 = sadd.s32 1, %s3195_s26   ;;  %s3777_s24 = sld [smem:[#allocation5_spill]] }
0x1019   : > { %p22_p5 = scmp.ge.s32.totalorder %s25_s26, 4   ;;  %s3778_s25 = sld [smem:[#allocation6_spill]] }
0x101a   : > { %s3779_s21 = smov %s3179_s22  ;;  %s3780_s22 = smov %s3183_s23 }
0x101b   : > { %s3781_s23 = smov %s3320_s16  ;;  %24 = sbr.rel (!%p22_p5) target bundleno = 6 (0x6), region = 133 }
0x1022   :  { %2500 = vsyncpa [#allocation3], 1 }
0x1023   :  { %2502 = vsyncpa [#allocation3 + $0x1], 1 }

</bundles_post_ra>
